<compile_context>
chip_gen: v5e
topology: v5e:2x2
jax: 0.10.0
libtpu: 0.0.40
codegen_flags: <defaults>
</compile_context>

<pallas_src>
import functools

import jax
import jax.numpy as jnp
from jax.experimental import pallas as pl
from jax.experimental.pallas import tpu as pltpu


# ---------------------------------------------------------------------------
# Hardware / tiling helpers
# ---------------------------------------------------------------------------
def _round_up(x: int, m: int) -> int:
    return ((x + m - 1) // m) * m


def _hardware_info() -> tuple[int, int]:
    """Return (vmem_capacity_bytes, num_tensorcores_guess).

    Falls back to the most conservative assumption (64 MiB VMEM, 2 cores,
    i.e. v7x-like) if the query is unavailable (e.g. interpret mode).
    """
    vmem_cap = 64 << 20
    try:
        vmem_cap = int(pltpu.get_tpu_info().vmem_capacity_bytes)
    except Exception:
        pass
    # v7x: 64 MiB VMEM per TensorCore, 2 TCs/chip; v5e/v6e: 128 MiB, 1 TC.
    num_cores = 2 if vmem_cap <= (64 << 20) else 1
    return vmem_cap, num_cores


def _tile_prefs(in_bytes: int, vmem_cap: int) -> tuple[int, int, int]:
    """Preferred (tm, tn, tk) by dtype width and VMEM generation."""
    big_vmem = vmem_cap >= (100 << 20)          # v5e / v6e (128 MiB VMEM)
    if in_bytes <= 2:                           # bf16 (MXU-native)
        if big_vmem:
            return 1024, 1024, 512              # v6e needs ~650 flop/byte
        return 512, 1024, 512                   # v7x: ~341 flop/byte, ~12 MiB
    # f32 path
    if big_vmem:
        return 512, 512, 512
    return 256, 512, 512


def _pick_tile(dim: int, preferred: int, align: int) -> tuple[int, int]:
    """Return (tile, padded_dim).

    `tile` is a multiple of `align` (so the BlockSpec (8,128) rule holds) and
    `padded_dim` is a multiple of `tile`.  Prefers a tile >= preferred/2 that
    divides the aligned dim exactly; otherwise pads up to `preferred`.
    """
    dim_a = _round_up(dim, align)
    if dim_a <= preferred:
        return dim_a, dim_a
    t = preferred
    while t >= max(align, preferred // 2):
        if dim_a % t == 0:
            return t, dim_a
        t -= align
    return preferred, _round_up(dim_a, preferred)


# ---------------------------------------------------------------------------
# Kernels
# ---------------------------------------------------------------------------
def _make_linear_kernel(add_bias: bool, acc_into_out: bool):
    """Build the (i, j, k) matmul step kernel.

    add_bias:     bias (1, tn) f32 tile is the third input ref.
    acc_into_out: output dtype is f32 -> accumulate directly into o_ref
                  (resident across k); otherwise use an f32 VMEM scratch.
    """
    if acc_into_out:
        def kernel(*refs):
            if add_bias:
                x_ref, w_ref, b_ref, o_ref = refs
            else:
                x_ref, w_ref, o_ref = refs
            k = pl.program_id(2)

            @pl.when(k == 0)
            def _init():
                o_ref[...] = jnp.zeros_like(o_ref)

            o_ref[...] += jnp.dot(x_ref[...], w_ref[...],
                                  preferred_element_type=jnp.float32)

            if add_bias:
                @pl.when(k == pl.num_programs(2) - 1)
                def _fin():
                    o_ref[...] = o_ref[...] + b_ref[...]
        return kernel

    def kernel(*refs):
        if add_bias:
            x_ref, w_ref, b_ref, o_ref, acc_ref = refs
        else:
            x_ref, w_ref, o_ref, acc_ref = refs
        k = pl.program_id(2)

        @pl.when(k == 0)
        def _init():
            acc_ref[...] = jnp.zeros_like(acc_ref)

        acc_ref[...] += jnp.dot(x_ref[...], w_ref[...],
                                preferred_element_type=jnp.float32)

        @pl.when(k == pl.num_programs(2) - 1)
        def _fin():
            if add_bias:
                o_ref[...] = (acc_ref[...] + b_ref[...]).astype(o_ref.dtype)
            else:
                o_ref[...] = acc_ref[...].astype(o_ref.dtype)
    return kernel


# ---------------------------------------------------------------------------
# Pallas linear on pre-padded weight: O = X @ W_kn (+ bias)
# ---------------------------------------------------------------------------
@functools.partial(
    jax.jit,
    static_argnames=("n_true", "out_dtype", "tm", "tn", "tk", "vmem_limit"))
def _pallas_linear_padded(x2d, w_padded, bias_padded, *, n_true, out_dtype,
                          tm, tn, tk, vmem_limit):
    """x2d: [M, K_true], w_padded: [K_pad, N_pad], bias_padded: [1, N_pad]|None."""
    M, K = x2d.shape
    K_pad, N_pad = w_padded.shape
    M_pad = _round_up(M, tm)

    # Only the (small) activation is padded per call; weight/bias were padded
    # once at init.
    if (M_pad, K_pad) != (M, K):
        x2d = jnp.pad(x2d, ((0, M_pad - M), (0, K_pad - K)))

    add_bias = bias_padded is not None
    acc_into_out = jnp.dtype(out_dtype) == jnp.dtype(jnp.float32)
    kernel = _make_linear_kernel(add_bias, acc_into_out)

    inputs = [x2d, w_padded]
    in_specs = [
        pl.BlockSpec((tm, tk), lambda i, j, k: (i, k)),   # X tile
        pl.BlockSpec((tk, tn), lambda i, j, k: (k, j)),   # W tile ([K, N], no .T)
    ]
    if add_bias:
        inputs.append(bias_padded)
        in_specs.append(pl.BlockSpec((1, tn), lambda i, j, k: (0, j)))

    grid = (M_pad // tm, N_pad // tn, K_pad // tk)

    in_bytes = x2d.dtype.itemsize
    out_bytes = jnp.dtype(out_dtype).itemsize
    cost = pl.CostEstimate(
        flops=2 * M_pad * N_pad * K_pad,
        transcendentals=0,
        bytes_accessed=(M_pad * K_pad * in_bytes
                        + K_pad * N_pad * in_bytes
                        + M_pad * N_pad * out_bytes
                        + (N_pad * 4 if add_bias else 0)),
    )

    scratch = () if acc_into_out else (pltpu.VMEM((tm, tn), jnp.float32),)

    # TODO(synk): for pure decode shapes (single i-block, weight-stream bound)
    # a pipeline_mode=pl.Buffered(3) on the W BlockSpec is worth sweeping.

    out = pl.pallas_call(
        kernel,
        out_shape=jax.ShapeDtypeStruct((M_pad, N_pad), out_dtype),
        grid_spec=pltpu.PrefetchScalarGridSpec(
            num_scalar_prefetch=0,
            grid=grid,
            in_specs=in_specs,
            out_specs=pl.BlockSpec((tm, tn), lambda i, j, k: (i, j)),
            scratch_shapes=scratch,
        ),
        compiler_params=pltpu.CompilerParams(
            dimension_semantics=("parallel", "parallel", "arbitrary"),
            vmem_limit_bytes=vmem_limit,
        ),
        cost_estimate=cost,
    )(*inputs)

    if (M_pad, N_pad) != (M, n_true):
        out = out[:M, :n_true]
    return out


# ---------------------------------------------------------------------------
# Module wrapper (vLLM ColumnParallelLinear, tp_size == 1)
# ---------------------------------------------------------------------------
class ColumnParallelLinearPallas:
    """JAX/Pallas re-implementation of vLLM ColumnParallelLinear (tp_size=1)."""

    def __init__(self, input_size: int, output_size: int, bias: bool = True,
                 gather_output: bool = False, skip_bias_add: bool = False,
                 params_dtype=jnp.float32, use_bf16_compute: bool = False,
                 seed: int = 0):
        self.input_size = input_size
        self.output_size = output_size
        tp_size = 1  # single device: get_tensor_model_parallel_world_size()==1
        assert output_size % tp_size == 0
        self.output_size_per_partition = output_size // tp_size
        self.gather_output = gather_output
        self.skip_bias_add = skip_bias_add
        self.params_dtype = jnp.dtype(params_dtype)

        # Numerics policy (opt-in): run the MXU in bf16 for f32 params/inputs,
        # keeping f32 accumulation inside the kernel.
        if use_bf16_compute and self.params_dtype == jnp.dtype(jnp.float32):
            self.compute_dtype = jnp.dtype(jnp.bfloat16)
        else:
            self.compute_dtype = self.params_dtype

        # Hardware-aware tiling decided once at init.
        self._vmem_cap, self._num_cores = _hardware_info()
        in_bytes = self.compute_dtype.itemsize
        self._align_m = max(8, 32 // in_bytes)   # sublane packing: 8/16/32
        pref_tm, pref_tn, pref_tk = _tile_prefs(in_bytes, self._vmem_cap)
        self._pref_tm = pref_tm
        self._tn, n_pad = _pick_tile(self.output_size_per_partition, pref_tn, 128)
        self._tk, k_pad = _pick_tile(self.input_size, pref_tk, 128)

        # Deterministic parameter init (torch.empty in the reference is
        # uninitialized; we use small random values for a synthetic kernel).
        kw, kb = jax.random.split(jax.random.PRNGKey(seed))
        # weight: [output_size_per_partition, input_size] (PyTorch layout).
        self.weight = (jax.random.normal(
            kw, (self.output_size_per_partition, self.input_size),
            dtype=jnp.float32) * 0.02).astype(self.params_dtype)

        # One-time transpose to [K, N] + zero-pad to (K_pad, N_pad) so the
        # kernel never transposes per step and no per-call weight padding
        # (full HBM re-write of W) is needed.
        w_kn = jnp.transpose(self.weight).astype(self.compute_dtype)
        if (k_pad, n_pad) != (self.input_size, self.output_size_per_partition):
            w_kn = jnp.pad(w_kn, ((0, k_pad - self.input_size),
                                  (0, n_pad - self.output_size_per_partition)))
        self.weight_kn_padded = w_kn

        if bias:
            self.bias = (jax.random.normal(
                kb, (self.output_size_per_partition,),
                dtype=jnp.float32) * 0.02).astype(self.params_dtype)
            b2d = self.bias.astype(jnp.float32).reshape(
                1, self.output_size_per_partition)
            if n_pad != self.output_size_per_partition:
                b2d = jnp.pad(
                    b2d, ((0, 0), (0, n_pad - self.output_size_per_partition)))
            self.bias_padded = b2d
        else:
            self.bias = None
            self.bias_padded = None

    def __call__(self, x: jax.Array):
        bias_padded = self.bias_padded if not self.skip_bias_add else None
        add_bias = bias_padded is not None

        lead_shape = x.shape[:-1]
        out_dtype = jnp.dtype(x.dtype)
        x2d = x.reshape(-1, self.input_size)
        # NOTE: if x.dtype != compute_dtype the activations are down-cast to
        # the compute dtype (deliberate precision/perf policy; accumulation
        # stays f32 inside the kernel).
        if x2d.dtype != self.compute_dtype:
            x2d = x2d.astype(self.compute_dtype)

        M = x2d.shape[0]
        tm, m_pad = _pick_tile(M, self._pref_tm, self._align_m)
        tn, tk = self._tn, self._tk
        k_pad, n_pad = self.weight_kn_padded.shape

        # Megacore: only on 2-TC chips (v7x).  If a single (i, j) output block
        # would be produced, split the dim whose operand re-stream is cheaper
        # (splitting M doubles W reads, splitting N doubles X reads).
        if self._num_cores >= 2 and (m_pad // tm) * (n_pad // tn) == 1:
            can_split_m = tm % (2 * self._align_m) == 0
            can_split_n = tn % 256 == 0
            if can_split_m and (m_pad >= n_pad or not can_split_n):
                tm //= 2
            elif can_split_n:
                tn //= 2

        # Double-buffered working-set footprint -> scoped-VMEM budget, capped
        # at 0.75x the physical VMEM of this generation.
        acc_into_out = out_dtype == jnp.dtype(jnp.float32)
        in_bytes = self.compute_dtype.itemsize
        out_bytes = out_dtype.itemsize
        footprint = (2 * tm * tk * in_bytes            # X buffers
                     + 2 * tk * tn * in_bytes          # W buffers
                     + 2 * tm * tn * out_bytes         # output buffers
                     + (0 if acc_into_out else tm * tn * 4)   # f32 acc scratch
                     + (2 * 8 * tn * 4 if add_bias else 0))   # bias (8-sublane pad)
        vmem_limit = int(min(max(footprint * 1.5 + (2 << 20), 16 << 20),
                             0.75 * self._vmem_cap))

        out2d = _pallas_linear_padded(
            x2d, self.weight_kn_padded, bias_padded,
            n_true=self.output_size_per_partition, out_dtype=out_dtype,
            tm=tm, tn=tn, tk=tk, vmem_limit=vmem_limit)

        output_parallel = out2d.reshape(*lead_shape,
                                        self.output_size_per_partition)

        # TODO(synk): gather_output would need tensor_model_parallel_all_gather
        # (cross-device RDMA); with tp_size=1 it is a no-op.
        output = output_parallel
        output_bias = self.bias if self.skip_bias_add else None
        return output, output_bias


# ---------------------------------------------------------------------------
# Self-test
# ---------------------------------------------------------------------------
if __name__ == "__main__":
    batch, seq, input_size, output_size = 2, 8, 32, 64

    key = jax.random.PRNGKey(0)
    x = jax.random.normal(key, (batch, seq, input_size), dtype=jnp.float32)

    # 1) f32 path, bias added.
    layer = ColumnParallelLinearPallas(input_size, output_size, bias=True, seed=0)
    out, out_bias = layer(x)
    out = jax.block_until_ready(out)
    ref = x @ layer.weight.T + layer.bias
    assert out.shape == (batch, seq, output_size), out.shape
    assert out_bias is None
    assert jnp.allclose(out, ref, atol=1e-5, rtol=1e-5), float(
        jnp.max(jnp.abs(out - ref)))

    # 2) skip_bias_add path (bias returned, not added).
    layer2 = ColumnParallelLinearPallas(
        input_size, output_size, bias=True, skip_bias_add=True, seed=0)
    out2, out_bias2 = layer2(x)
    out2 = jax.block_until_ready(out2)
    ref2 = x @ layer2.weight.T
    assert out_bias2 is not None and out_bias2.shape == (output_size,)
    assert jnp.allclose(out2, ref2, atol=1e-5, rtol=1e-5)

    # 3) Non-aligned dims (padding path: K, N not multiples of 128; N padded
    #    once at init, only x padded per call).
    M3, K3, N3 = 48, 96, 320
    x3 = jax.random.normal(jax.random.PRNGKey(1), (M3, K3), dtype=jnp.float32)
    layer3 = ColumnParallelLinearPallas(K3, N3, bias=True, seed=1)
    out3, _ = layer3(x3)
    out3 = jax.block_until_ready(out3)
    ref3 = x3 @ layer3.weight.T + layer3.bias
    assert out3.shape == (M3, N3)
    assert jnp.allclose(out3, ref3, atol=1e-4, rtol=1e-4), float(
        jnp.max(jnp.abs(out3 - ref3)))

    # 4) bf16 parameters / bf16 MXU path with f32 accumulation.
    layer4 = ColumnParallelLinearPallas(
        input_size, output_size, bias=True, params_dtype=jnp.bfloat16, seed=0)
    x_bf16 = x.astype(jnp.bfloat16)
    out4, _ = layer4(x_bf16)
    out4 = jax.block_until_ready(out4)
    ref4 = (x_bf16.astype(jnp.float32) @ layer4.weight.astype(jnp.float32).T
            + layer4.bias.astype(jnp.float32))
    assert out4.dtype == jnp.bfloat16
    assert jnp.allclose(out4.astype(jnp.float32), ref4, atol=5e-2, rtol=5e-2)

    # 5) Opt-in bf16 compute for f32 params/inputs (f32 output, f32 accum).
    layer5 = ColumnParallelLinearPallas(
        input_size, output_size, bias=True, use_bf16_compute=True, seed=0)
    out5, _ = layer5(x)
    out5 = jax.block_until_ready(out5)
    ref5 = x @ layer5.weight.T + layer5.bias
    assert out5.dtype == jnp.float32
    assert jnp.allclose(out5, ref5, atol=2e-2, rtol=2e-2), float(
        jnp.max(jnp.abs(out5 - ref5)))

    print("KERNEL_OK")
</pallas_src>

<mosaic_0001>
module attributes {stable_mosaic.version = 11 : i64} {
  func.func @kernel(%arg0: i32, %arg1: i32, %arg2: i32, %arg3: memref<8x128xf32, #tpu.memory_space<vmem>>, %arg4: memref<128x128xf32, #tpu.memory_space<vmem>>, %arg5: memref<1x128xf32, #tpu.memory_space<vmem>>, %arg6: memref<8x128xf32, #tpu.memory_space<vmem>>) attributes {dimension_semantics = [#tpu.dimension_semantics<parallel>, #tpu.dimension_semantics<parallel>, #tpu.dimension_semantics<arbitrary>], iteration_bounds = array<i64: 2, 1, 1>, scalar_prefetch = 0 : i64, scratch_operands = 0 : i64, tpu.core_type = #tpu.core_type<tc>, window_params = [{transform_indices = @transform_0, window_bounds = array<i64: 8, 128>}, {transform_indices = @transform_1, window_bounds = array<i64: 128, 128>}, {transform_indices = @transform_2, window_bounds = array<i64: 1, 128>}, {transform_indices = @transform_3, window_bounds = array<i64: 8, 128>}]} {
    %c0_i32 = arith.constant 0 : i32
    %0 = arith.cmpi eq, %arg2, %c0_i32 : i32
    %1 = arith.extui %0 : i1 to i32
    %c0_i32_0 = arith.constant 0 : i32
    %2 = arith.cmpi ne, %1, %c0_i32_0 : i32
    scf.if %2 {
      %cst_10 = arith.constant 0.000000e+00 : f32
      %12 = vector.broadcast %cst_10 : f32 to vector<8x128xf32>
      %c0_11 = arith.constant 0 : index
      %c0_12 = arith.constant 0 : index
      %13 = vector.load %arg6[%c0_11, %c0_12] : memref<8x128xf32, #tpu.memory_space<vmem>>, vector<8x128xf32>
      tpu.vector_store %arg6[%c0_11, %c0_12], %12 {strides = array<i32>} : memref<8x128xf32, #tpu.memory_space<vmem>>, vector<8x128xf32>,
    } else {
    }
    %c0 = arith.constant 0 : index
    %c0_1 = arith.constant 0 : index
    %3 = vector.load %arg6[%c0, %c0_1] : memref<8x128xf32, #tpu.memory_space<vmem>>, vector<8x128xf32>
    %c0_2 = arith.constant 0 : index
    %c0_3 = arith.constant 0 : index
    %4 = vector.load %arg3[%c0_2, %c0_3] : memref<8x128xf32, #tpu.memory_space<vmem>>, vector<8x128xf32>
    %c0_4 = arith.constant 0 : index
    %c0_5 = arith.constant 0 : index
    %5 = vector.load %arg4[%c0_4, %c0_5] : memref<128x128xf32, #tpu.memory_space<vmem>>, vector<128x128xf32>
    %cst = arith.constant dense<0.000000e+00> : vector<8x128xf32>
    %6 = tpu.matmul %4, %5, %cst {dimension_numbers = #tpu.dot_dimension_numbers<[1], [0], [0], [1], [0, 0, 1, 1], [], []>} : vector<8x128xf32>, vector<128x128xf32>, vector<8x128xf32> -> vector<8x128xf32>
    %7 = arith.addf %3, %6 : vector<8x128xf32>
    %c0_6 = arith.constant 0 : index
    %c0_7 = arith.constant 0 : index
    %8 = vector.load %arg6[%c0_6, %c0_7] : memref<8x128xf32, #tpu.memory_space<vmem>>, vector<8x128xf32>
    tpu.vector_store %arg6[%c0_6, %c0_7], %7 {strides = array<i32>} : memref<8x128xf32, #tpu.memory_space<vmem>>, vector<8x128xf32>,
    %c0_i32_8 = arith.constant 0 : i32
    %9 = arith.cmpi eq, %arg2, %c0_i32_8 : i32
    %10 = arith.extui %9 : i1 to i32
    %c0_i32_9 = arith.constant 0 : i32
    %11 = arith.cmpi ne, %10, %c0_i32_9 : i32
    scf.if %11 {
      %c0_10 = arith.constant 0 : index
      %c0_11 = arith.constant 0 : index
      %12 = vector.load %arg6[%c0_10, %c0_11] : memref<8x128xf32, #tpu.memory_space<vmem>>, vector<8x128xf32>
      %c0_12 = arith.constant 0 : index
      %c0_13 = arith.constant 0 : index
      %13 = vector.load %arg5[%c0_12, %c0_13] : memref<1x128xf32, #tpu.memory_space<vmem>>, vector<1x128xf32>
      %14 = vector.broadcast %13 : vector<1x128xf32> to vector<8x128xf32>
      %15 = arith.addf %12, %14 : vector<8x128xf32>
      %c0_14 = arith.constant 0 : index
      %c0_15 = arith.constant 0 : index
      %16 = vector.load %arg6[%c0_14, %c0_15] : memref<8x128xf32, #tpu.memory_space<vmem>>, vector<8x128xf32>
      tpu.vector_store %arg6[%c0_14, %c0_15], %15 {strides = array<i32>} : memref<8x128xf32, #tpu.memory_space<vmem>>, vector<8x128xf32>,
    } else {
    }
    return
  }
  func.func @transform_0(%arg0: i32, %arg1: i32, %arg2: i32) -> (i32, i32) {
    %c0_i32 = arith.constant 0 : i32
    return %arg0, %arg2 : i32, i32
  }
  func.func @transform_1(%arg0: i32, %arg1: i32, %arg2: i32) -> (i32, i32) {
    %c0_i32 = arith.constant 0 : i32
    return %arg2, %arg1 : i32, i32
  }
  func.func @transform_2(%arg0: i32, %arg1: i32, %arg2: i32) -> (i32, i32) {
    %c0_i32 = arith.constant 0 : i32
    %c0_i32_0 = arith.constant 0 : i32
    return %c0_i32, %arg1 : i32, i32
  }
  func.func @transform_3(%arg0: i32, %arg1: i32, %arg2: i32) -> (i32, i32) {
    %c0_i32 = arith.constant 0 : i32
    return %arg0, %arg1 : i32, i32
  }
}

</mosaic_0001>

<bundles_post_ra>
// kernel: _pallas_linear_padded.1
= control target key start
LH: loop header
LB: loop body
LE: loop exit
PB: predicated region body
PF: predicated region fallthrough
CT: control target
= control target key end

     0   :  { %8 = vsyncpa [#allocation3], 0  ;;  %s739_s0 = inlined_call_operand.vmem [shape: f32[16,128], index: 0, kind: input, shape index: {}]   ;;  %s740_s1 = inlined_call_operand.hbm [shape: f32[128,128], index: 1, kind: input, shape index: {}]   ;;  %s741_s2 = inlined_call_operand.vmem [shape: f32[1,128], index: 2, kind: input, shape index: {}]   ;;  %s742_s3 = inlined_call_operand.hbm [shape: f32[16,128], index: 3, kind: output, shape index: {}]  }
   0x1   :  { %9 = vsyncpa [#allocation4], 0 }
   0x2   :  { %11 = vsyncpa [#allocation4 + $0x1], 0  ;;  %s636_s12 = smov 0   ;;  %s638_s13 = smov 0  }
   0x3   :  { %s640_s14 = smov 0   ;;  %s642_s15 = smov 0  }
   0x4   :  { %s644_s16 = smov 0   ;;  %s646_s17 = smov 0  }
   0x5 LB: > { %s415_s18 = sadd.s32 4294967295, %s611_s17   ;;  %s416_s19 = sadd.s32 4294967294, %s611_s17   ;;  %s611_s17 = sphi %s646_s17, %s17_s17   ;;  %s607_s16 = sphi %s644_s16, %s749_s16   ;;  %s603_s15 = sphi %s642_s15, %s748_s15   ;;  %s599_s14 = sphi %s640_s14, %s747_s14   ;;  %s595_s13 = sphi %s638_s13, %s746_s13   ;;  %s591_s12 = sphi %s636_s12, %s745_s12  }
   0x6   : > { %s36_s20 = sadd.s32 1, %s607_s16  ;;  %s127_s21 = sadd.s32 1, %s599_s14 }
   0x7   : > { %p38_p0 = scmp.ge.s32.totalorder %s36_s20, 2  ;;  %p137_p1 = scmp.ne.s32.totalorder %s599_s14, %s595_s13 }
   0x8   : > { %p138_p2 = scmp.eq.s32.totalorder %s415_s18, 1  ;;  %p143_p3 = scmp.ne.s32.totalorder %s595_s13, %s591_s12 }
   0x9   : > { %s751_s20 = smov (%p38_p0, %s36_s20), 0  ;;  %p144_p5 = scmp.eq.s32.totalorder %s416_s19, 1 }
   0xa   : > { %p676_p4 = por %p138_p2, %p137_p1  ;;  %s122_s23 = ssub.s32 %s607_s16, %s751_s20 }
   0xb   : > { %p417_p6 = scmp.ge.s32.totalorder %s611_s17, 1  ;;  %p125_p7 = scmp.eq.s32.totalorder %s122_s23, 0 }
   0xc   : > { %p683_p8 = por %p144_p5, %p143_p3  ;;  %p151_p9 = scmp.lt.s32.totalorder %s611_s17, 3 }
   0xd   : > { %s689_s25 = scalar_select %p125_p7, %s599_s14, %s127_s21  }
   0xe   : > { %p152_p10 = pnand %p417_p6, %p151_p9  ;;  %p443_p11 = scmp.eq.s32.totalorder %s415_s18, 0 }
   0xf   : > { %s166_s28 = sshll.u32 %s740_s1, 4  ;;  %s613_s29 = smov [#allocation2]   ;;  %s167_s28 = int_to_ptr.hbm [resolvable:$true] %s166_s28 }
  0x10   : > { %p435_p12 = pneg %p152_p10  ;;  %s168_s30 = sshll.u32 %s613_s29, 4  ;;  %s169_s30 = int_to_ptr.vmem [resolvable:$true] %s168_s30 }
  0x11   : > { %s614_s4 = smov 128   ;;  %s615_s5 = smov 8  }
  0x12   : > { %p436_p13 = pnand %p443_p11, %p435_p12  ;;  %200 = sbr.rel (%p152_p10) target bundleno = 187 (0xbb), region = 32 }
  0x14   : > { %438 = dma.hbm_to_vmem [thread:$0]  (!%p436_p13), %s167_s28, 2048, %s169_s30, [#allocation3], %s614_s4, %s614_s4, %s615_s5  }
  0x17   : > { %582 = dma.done.wait (%p443_p11), [#allocation3], 2048  }
  0x18   : > { %584 = vsyncadd (%p443_p11), [#allocation3], 4294965248  ;;  %v263_v0 = vld [vmem:[#allocation2 + $0x78] sm:$0xff]  ;;  %v262_v1 = vld [vmem:[#allocation2 + $0x70] sm:$0xff]  ;;  %p230_p0 = scmp.lt.s32.totalorder %s603_s15, 1  ;;  %s227_s11 = sand.u32 1, %s595_s13  }
  0x19   : > { %264 = vmatpush.msra.mxu0 %v263_v0  ;;  %v261_v2 = vld [vmem:[#allocation2 + $0x68] sm:$0xff]  ;;  %v260_v3 = vld [vmem:[#allocation2 + $0x60] sm:$0xff]  ;;  %v259_v4 = vld [vmem:[#allocation2 + $0x58] sm:$0xff]  ;;  %s423_s18 = sshll.u32 %s227_s11, 3  ;;  %s426_s19 = sshll.u32 %s603_s15, 3 }
  0x1a   : > { %v258_v5 = vld [vmem:[#allocation2 + $0x50] sm:$0xff]  ;;  %v257_v6 = vld [vmem:[#allocation2 + $0x48] sm:$0xff]  ;;  %v256_v7 = vld [vmem:[#allocation2 + $0x40] sm:$0xff]  ;;  %s231_s6 = scalar_select %p230_p0, %s603_s15, 1 }
  0x1b   : > { %265 = vmatpush.msra.mxu0 %v262_v1  ;;  %v255_v8 = vld [vmem:[#allocation2 + $0x38] sm:$0xff]  ;;  %v254_v9 = vld [vmem:[#allocation2 + $0x30] sm:$0xff]  ;;  %v253_v10 = vld [vmem:[#allocation2 + $0x28] sm:$0xff]  ;;  %s308_s26 = scalar_lea.hbm %s742_s3, %s426_s19  ;;  %s229_s29 = scalar_lea.vmem [#allocation5], %s423_s18 }
  0x1c   : > { %v252_v11 = vld [vmem:[#allocation2 + $0x20] sm:$0xff]  ;;  %v251_v12 = vld [vmem:[#allocation2 + $0x18] sm:$0xff]  ;;  %s424_s7 = sshll.u32 %s231_s6, 3  ;;  %v250_v13 = vld [vmem:[#allocation2 + $0x10] sm:$0xff]  ;;  %s310_s30 = sshll.u32 %s229_s29, 4  ;;  %s311_s30 = int_to_ptr.vmem [resolvable:$true] %s310_s30 }
  0x1d   : > { %266 = vmatpush.msra.mxu0 %v261_v2  ;;  %v249_v14 = vld [vmem:[#allocation2 + $0x8] sm:$0xff]  ;;  %s236_s10 = scalar_lea.vmem %s739_s0, %s424_s7  ;;  %v248_v15 = vld [vmem:[#allocation2] sm:$0xff]  ;;  %s312_s4 = sshll.u32 %s308_s26, 4  ;;  %s313_s4 = int_to_ptr.hbm [resolvable:$true] %s312_s4 }
  0x1e   : > { %v247_v16 = vld [vmem:[%s236_s10] sm:$0xff]  ;;  %s297_s5 = scalar_lea.sflag [#allocation4], %s227_s11  ;;  %s543_s6 = sshra.s32 %s313_s4, 4  ;;  %s544_s6 = int_to_ptr.hbm [resolvable:$true] %s543_s6 }
  0x1f   : > { %267 = vmatpush.msra.mxu0 %v260_v3  ;;  %v498_v17 = vld [vmem:[%s741_s2] ss:$0 sm:$0xff]  ;;  %s545_s15 = scalar_lea.hbm %s544_s6, 8  ;;  %s549_s9 = scalar_lea.hbm %s742_s3, 16 }
  0x20   : > { %p546_p1 = scmp.ne.s32.totalorder %s544_s6, %s545_s15  ;;  %p550_p5 = scmp.lt.s32.totalorder %s544_s6, %s742_s3 }
  0x21   : > { %268 = vmatpush.msra.mxu0 %v259_v4  ;;  %p551_p6 = scmp.lt.s32.totalorder %s549_s9, %s545_s15 }
  0x22   : > { %p547_p2 = pnand %p546_p1, %p676_p4 }
  0x23   : > { %269 = vmatpush.msra.mxu0 %v258_v5  ;;  %p552_p7 = por %p551_p6, %p550_p5 }
  0x24   : > { %p548_p3 = pneg %p547_p2 }
  0x25   : > { %270 = vmatpush.msra.mxu0 %v257_v6 }
  0x26   : > { %p553_p9 = pnand %p552_p7, %p548_p3 }
  0x27   : > { %271 = vmatpush.msra.mxu0 %v256_v7 }
  0x29   : > { %272 = vmatpush.msra.mxu0 %v255_v8 }
  0x2b   : > { %273 = vmatpush.msra.mxu0 %v254_v9 }
  0x2d   : > { %274 = vmatpush.msra.mxu0 %v253_v10 }
  0x2f   : > { %275 = vmatpush.msra.mxu0 %v252_v11 }
  0x31   : > { %276 = vmatpush.msra.mxu0 %v251_v12 }
  0x33   : > { %277 = vmatpush.msra.mxu0 %v250_v13 }
  0x35   : > { %278 = vmatpush.msra.mxu0 %v249_v14 }
  0x37   : > { %279 = vmatpush.msra.mxu0 %v248_v15 }
  0x38   : > { %280 = vmatmul.f32.vlgmr.msra.gmra.mxu0 %v247_v16 }
  0xb5   : > { %v281_v18 = vpop.f32.mrf.mxu0 }
  0xb6   : > { %v294_v19 = vadd.f32 %v498_v17, %v281_v18 }
  0xb8   : > { %295 = vst [vmem:[%s229_s29] sm:$0xff] %v294_v19 }
  0xb9   : > { %556 = shalt.err (!%p553_p9)
}
  0xba   : > { %433 = dma.vmem_to_hbm [thread:$0]  (%p676_p4), %s311_s30, 128, %s313_s4, %s297_s5  }
  0xbb PF: > { %p445_p10 = scmp.ge.s32.totalorder %s611_s17, 2  ;;  %s324_s11 = sand.u32 1, %s591_s12  }
  0xbc   : > { %s325_s19 = scalar_lea.sflag [#allocation4], %s324_s11 }
  0xbd   : > { %p440_p11 = pnand %p445_p10, %p683_p8 }
  0xbf   : > { %p441_p12 = pneg %p440_p11 }
  0xc1   : > { %586 = dma.done.wait (%p441_p12), %s325_s19, 128  }
  0xc2   : > { %588 = vsyncadd (%p441_p12), %s325_s19, 4294967168  ;;  %s17_s17 = sadd.s32 1, %s611_s17   ;;  %s745_s12 = smov %s595_s13 }
  0xc3   : > { %p14_p13 = scmp.ge.s32.totalorder %s17_s17, 4   ;;  %s746_s13 = smov %s599_s14 }
  0xc4   : > { %s747_s14 = smov %s689_s25  ;;  %s748_s15 = smov %s607_s16 }
  0xc5   : > { %s749_s16 = smov %s751_s20  ;;  %16 = sbr.rel (!%p14_p13) target bundleno = 5 (0x5), region = 84 }
  0xca   :  { %331 = vsyncpa [#allocation3], 1 }
  0xcb   :  { %333 = vsyncpa [#allocation3 + $0x1], 1 }
  0xcc   :  { %334 = vsyncpa [#allocation4], 1 }
  0xcd   :  { %336 = vsyncpa [#allocation4 + $0x1], 1 }

</bundles_post_ra>
